<compile_context>
chip_gen: v7x
topology: tpu7x:2x2x1
jax: 0.10.0
libtpu: 0.0.40
codegen_flags: <defaults>
</compile_context>

<pallas_src>
import functools
import math

import jax
import jax.numpy as jnp
from jax import lax
from jax.experimental import pallas as pl
from jax.experimental.pallas import tpu as pltpu


# ---------------------------------------------------------------------------
# small helpers
# ---------------------------------------------------------------------------
def _pick_tile(n, cap, mult=8):
    """Largest tile <= cap that exactly divides n and is a multiple of `mult`;
    falls back to n (a full-extent block dim is always legal)."""
    if n <= cap:
        return n
    start = (cap // mult) * mult
    for t in range(start, 0, -mult):
        if n % t == 0:
            return t
    return n


def _vmem_limit(block_bytes):
    est = int(2 * block_bytes) + (2 << 20)
    return int(max(32 << 20, min(96 << 20, est)))


# ---------------------------------------------------------------------------
# Pallas LayerNorm (the Encoder's `norm` layer, i.e. nn.LayerNorm(d_model))
# ---------------------------------------------------------------------------
def _layer_norm_kernel(x_ref, g_ref, b_ref, o_ref, *, eps):
    x = x_ref[...].astype(jnp.float32)                         # (rows_blk, D)
    mu = jnp.mean(x, axis=-1, keepdims=True)
    xc = x - mu
    var = jnp.mean(xc * xc, axis=-1, keepdims=True)
    inv = lax.rsqrt(var + eps)
    y = xc * inv * g_ref[...].astype(jnp.float32) + b_ref[...].astype(jnp.float32)
    o_ref[...] = y.astype(o_ref.dtype)


def pallas_layer_norm(x, gamma, beta, *, eps=1e-5, target_block_bytes=2 << 20):
    orig_shape = x.shape
    d = orig_shape[-1]
    x2 = x.reshape(-1, d)                # lane-dense: feature dim on lane axis
    rows = x2.shape[0]
    # Byte-capped row block (feedback): ~2 MiB per buffer, multiple of 8 rows.
    if d % 128 != 0 or rows <= 8:
        blk = rows
    else:
        blk = min(rows, max(8, (target_block_bytes // (4 * d)) // 8 * 8))
    grid = (pl.cdiv(rows, blk),)
    block_bytes = 2 * (2 * blk * d * 4) + 2 * d * 4
    out = pl.pallas_call(
        functools.partial(_layer_norm_kernel, eps=eps),
        out_shape=jax.ShapeDtypeStruct((rows, d), x.dtype),
        grid_spec=pltpu.PrefetchScalarGridSpec(
            num_scalar_prefetch=0,
            grid=grid,
            in_specs=[
                pl.BlockSpec((blk, d), lambda i: (i, 0)),
                pl.BlockSpec((1, d), lambda i: (0, 0)),
                pl.BlockSpec((1, d), lambda i: (0, 0)),
            ],
            out_specs=pl.BlockSpec((blk, d), lambda i: (i, 0)),
        ),
        compiler_params=pltpu.CompilerParams(
            dimension_semantics=("parallel",),
            vmem_limit_bytes=_vmem_limit(block_bytes)),
        cost_estimate=pl.CostEstimate(
            flops=int(8 * rows * d),
            transcendentals=0,
            bytes_accessed=int(2 * rows * d * x.dtype.itemsize)),
    )(x2, gamma.reshape(1, d), beta.reshape(1, d))
    return out.reshape(orig_shape)


class PallasLayerNorm:
    def __init__(self, d_model, eps=1e-5, dtype=jnp.float32):
        self.gamma = jnp.ones((d_model,), dtype)
        self.beta = jnp.zeros((d_model,), dtype)
        self.eps = eps

    def __call__(self, x):
        return pallas_layer_norm(x, self.gamma, self.beta, eps=self.eps)


# ---------------------------------------------------------------------------
# Fused QKV projection kernel (one x read -> q, k, v in bf16)
# ---------------------------------------------------------------------------
def _qkv_proj_kernel(x_ref, wq_ref, wk_ref, wv_ref, q_ref, k_ref, v_ref,
                     *, compute_dtype):
    x = x_ref[...].astype(compute_dtype)                       # bf16 MXU operand
    q_ref[...] = jnp.dot(x, wq_ref[...],
                         preferred_element_type=jnp.float32).astype(q_ref.dtype)
    k_ref[...] = jnp.dot(x, wk_ref[...],
                         preferred_element_type=jnp.float32).astype(k_ref.dtype)
    v_ref[...] = jnp.dot(x, wv_ref[...],
                         preferred_element_type=jnp.float32).astype(v_ref.dtype)


def _qkv_projection(x, wq, wk, wv, *, compute_dtype):
    b, l, d = x.shape
    rows = b * l
    x2 = x.reshape(rows, d)
    tr = _pick_tile(rows, 256) if d % 128 == 0 else rows
    grid = (pl.cdiv(rows, tr),)
    cd = jnp.dtype(compute_dtype)
    block_bytes = (2 * (tr * d * x.dtype.itemsize + 3 * tr * d * cd.itemsize)
                   + 2 * 3 * d * d * cd.itemsize)
    q2, k2, v2 = pl.pallas_call(
        functools.partial(_qkv_proj_kernel, compute_dtype=compute_dtype),
        out_shape=tuple(jax.ShapeDtypeStruct((rows, d), compute_dtype)
                        for _ in range(3)),
        grid_spec=pltpu.PrefetchScalarGridSpec(
            num_scalar_prefetch=0,
            grid=grid,
            in_specs=[
                pl.BlockSpec((tr, d), lambda i: (i, 0)),
                pl.BlockSpec((d, d), lambda i: (0, 0)),
                pl.BlockSpec((d, d), lambda i: (0, 0)),
                pl.BlockSpec((d, d), lambda i: (0, 0)),
            ],
            out_specs=[pl.BlockSpec((tr, d), lambda i: (i, 0)),
                       pl.BlockSpec((tr, d), lambda i: (i, 0)),
                       pl.BlockSpec((tr, d), lambda i: (i, 0))],
        ),
        compiler_params=pltpu.CompilerParams(
            dimension_semantics=("parallel",),
            vmem_limit_bytes=_vmem_limit(block_bytes)),
        cost_estimate=pl.CostEstimate(
            flops=int(6 * rows * d * d),
            transcendentals=0,
            bytes_accessed=int(rows * d * (x.dtype.itemsize + 3 * cd.itemsize)
                               + 3 * d * d * cd.itemsize)),
    )(x2, wq, wk, wv)
    return (q2.reshape(b, l, d), k2.reshape(b, l, d), v2.reshape(b, l, d))


# ---------------------------------------------------------------------------
# Flash-style self-attention core: online softmax over KV tiles,
# out-projection + residual (+ optional fused LayerNorm) in the epilogue.
# ---------------------------------------------------------------------------
def _make_flash_kernel(*, scale, has_bias, fuse_norm, ln_eps, compute_dtype):
    def kernel(*refs):
        i = 0
        q_ref = refs[i]; i += 1
        k_ref = refs[i]; i += 1
        v_ref = refs[i]; i += 1
        x_ref = refs[i]; i += 1
        wo_ref = refs[i]; i += 1
        bias_ref = None
        if has_bias:
            bias_ref = refs[i]; i += 1
        g_ref = b_ref = None
        if fuse_norm:
            g_ref = refs[i]; i += 1
            b_ref = refs[i]; i += 1
        y_ref = refs[i]; i += 1
        m_sc = refs[i]; i += 1
        l_sc = refs[i]; i += 1
        acc_sc = refs[i]; i += 1

        kvi = pl.program_id(2)

        @pl.when(kvi == 0)
        def _():
            m_sc[...] = jnp.full_like(m_sc, -jnp.inf)
            l_sc[...] = jnp.zeros_like(l_sc)
            acc_sc[...] = jnp.zeros_like(acc_sc)

        q = q_ref[0]                                            # (tq, D) bf16
        k = k_ref[0]                                            # (tk, D) bf16
        # q @ k^T on the MXU with bf16 operands, f32 accumulation.
        s = lax.dot_general(q, k, (((1,), (1,)), ((), ())),
                            preferred_element_type=jnp.float32) * scale
        if has_bias:
            s = s + bias_ref[0].astype(jnp.float32)

        # Online softmax (all elementwise math stays in f32 — v5e friendly).
        m_prev = m_sc[...]
        m_new = jnp.maximum(m_prev, jnp.max(s, axis=-1, keepdims=True))
        alpha = jnp.exp(m_prev - m_new)
        p = jnp.exp(s - m_new)
        l_sc[...] = alpha * l_sc[...] + jnp.sum(p, axis=-1, keepdims=True)
        acc_sc[...] = alpha * acc_sc[...] + jnp.dot(
            p.astype(compute_dtype), v_ref[0], preferred_element_type=jnp.float32)
        m_sc[...] = m_new

        @pl.when(kvi == pl.num_programs(2) - 1)
        def _():
            # Normalize the (tq, D) accumulator (not the (tq, tk) probs):
            # reciprocal goes to the EUP slot, VALU work drops by tk/D.
            inv = pl.reciprocal(l_sc[...], approx=True)
            o = (acc_sc[...] * inv).astype(compute_dtype)
            y = x_ref[0].astype(jnp.float32) + jnp.dot(
                o, wo_ref[...], preferred_element_type=jnp.float32)
            if fuse_norm:
                mu = jnp.mean(y, axis=-1, keepdims=True)
                yc = y - mu
                var = jnp.mean(yc * yc, axis=-1, keepdims=True)
                y = (yc * lax.rsqrt(var + ln_eps)
                     * g_ref[...].astype(jnp.float32)
                     + b_ref[...].astype(jnp.float32))
            y_ref[0] = y.astype(y_ref.dtype)

    return kernel


def _flash_attention(q, k, v, x, wo, bias, norm_params, *, scale,
                     compute_dtype, ln_eps=1e-5):
    b, l, d = x.shape
    tq = _pick_tile(l, 128)
    tk = _pick_tile(l, 256)
    grid = (b, l // tq, l // tk)

    has_bias = bias is not None
    fuse_norm = norm_params is not None

    inputs = [q, k, v, x, wo]
    in_specs = [
        pl.BlockSpec((1, tq, d), lambda bi, qi, kvi: (bi, qi, 0)),
        pl.BlockSpec((1, tk, d), lambda bi, qi, kvi: (bi, kvi, 0)),
        pl.BlockSpec((1, tk, d), lambda bi, qi, kvi: (bi, kvi, 0)),
        pl.BlockSpec((1, tq, d), lambda bi, qi, kvi: (bi, qi, 0)),
        pl.BlockSpec((d, d), lambda bi, qi, kvi: (0, 0)),
    ]
    bias_bytes = 0
    if has_bias:
        mb = bias.shape[0]
        if mb == 1:
            bias_map = lambda bi, qi, kvi: (0, qi, kvi)
        else:
            bias_map = lambda bi, qi, kvi: (bi, qi, kvi)
        inputs.append(bias)
        in_specs.append(pl.BlockSpec((1, tq, tk), bias_map))
        bias_bytes = int(bias.size) * bias.dtype.itemsize
    if fuse_norm:
        gamma, beta = norm_params
        inputs.append(gamma.reshape(1, d).astype(jnp.float32))
        inputs.append(beta.reshape(1, d).astype(jnp.float32))
        in_specs.append(pl.BlockSpec((1, d), lambda bi, qi, kvi: (0, 0)))
        in_specs.append(pl.BlockSpec((1, d), lambda bi, qi, kvi: (0, 0)))

    cd = jnp.dtype(compute_dtype)
    block_bytes = (2 * (tq * d * cd.itemsize + 2 * tk * d * cd.itemsize
                        + 2 * tq * d * x.dtype.itemsize)
                   + 2 * d * d * cd.itemsize
                   + (2 * tq * tk * 4 if has_bias else 0)
                   + tq * (2 + d) * 4)
    flops = 4 * b * l * l * d + 2 * b * l * d * d
    bytes_accessed = (b * l * d * (3 * cd.itemsize + 2 * x.dtype.itemsize)
                      + d * d * cd.itemsize + bias_bytes)

    kernel = _make_flash_kernel(scale=scale, has_bias=has_bias,
                                fuse_norm=fuse_norm, ln_eps=ln_eps,
                                compute_dtype=compute_dtype)
    y = pl.pallas_call(
        kernel,
        out_shape=jax.ShapeDtypeStruct((b, l, d), x.dtype),
        grid_spec=pltpu.PrefetchScalarGridSpec(
            num_scalar_prefetch=0,
            grid=grid,
            in_specs=in_specs,
            out_specs=pl.BlockSpec((1, tq, d), lambda bi, qi, kvi: (bi, qi, 0)),
            scratch_shapes=[
                pltpu.VMEM((tq, 1), jnp.float32),    # running max m
                pltpu.VMEM((tq, 1), jnp.float32),    # running denom l
                pltpu.VMEM((tq, d), jnp.float32),    # output accumulator
            ],
        ),
        compiler_params=pltpu.CompilerParams(
            dimension_semantics=("parallel", "parallel", "arbitrary"),
            vmem_limit_bytes=_vmem_limit(block_bytes)),
        cost_estimate=pl.CostEstimate(
            flops=int(flops),
            transcendentals=int(b * l * l),
            bytes_accessed=int(bytes_accessed)),
    )(*inputs)
    return y


# ---------------------------------------------------------------------------
# Optional attention-probability kernel (only when output_attention=True);
# probabilities are stored in bf16 to halve HBM traffic.
# ---------------------------------------------------------------------------
def _make_probs_kernel(*, scale, has_bias):
    def kernel(*refs):
        i = 0
        q_ref = refs[i]; i += 1
        k_ref = refs[i]; i += 1
        bias_ref = None
        if has_bias:
            bias_ref = refs[i]; i += 1
        p_ref = refs[i]
        s = lax.dot_general(q_ref[0], k_ref[0], (((1,), (1,)), ((), ())),
                            preferred_element_type=jnp.float32) * scale
        if has_bias:
            s = s + bias_ref[0].astype(jnp.float32)
        m = jnp.max(s, axis=-1, keepdims=True)
        p = jnp.exp(s - m)
        p = p * pl.reciprocal(jnp.sum(p, axis=-1, keepdims=True), approx=True)
        p_ref[0] = p.astype(p_ref.dtype)
    return kernel


def _attention_probs(q, k, bias, *, scale, out_dtype=jnp.bfloat16):
    b, l, d = q.shape
    tq = _pick_tile(l, 128)
    grid = (b, l // tq)
    has_bias = bias is not None
    inputs = [q, k]
    in_specs = [
        pl.BlockSpec((1, tq, d), lambda bi, qi: (bi, qi, 0)),
        pl.BlockSpec((1, l, d), lambda bi, qi: (bi, 0, 0)),
    ]
    if has_bias:
        mb = bias.shape[0]
        if mb == 1:
            bmap = lambda bi, qi: (0, qi, 0)
        else:
            bmap = lambda bi, qi: (bi, qi, 0)
        inputs.append(bias)
        in_specs.append(pl.BlockSpec((1, tq, l), bmap))
    return pl.pallas_call(
        _make_probs_kernel(scale=scale, has_bias=has_bias),
        out_shape=jax.ShapeDtypeStruct((b, l, l), out_dtype),
        grid_spec=pltpu.PrefetchScalarGridSpec(
            num_scalar_prefetch=0,
            grid=grid,
            in_specs=in_specs,
            out_specs=pl.BlockSpec((1, tq, l), lambda bi, qi: (bi, qi, 0)),
        ),
        compiler_params=pltpu.CompilerParams(
            dimension_semantics=("parallel", "parallel")),
    )(*inputs)


# ---------------------------------------------------------------------------
# Representative Pallas attention layer with the (x, attn_mask, tau, delta)
# -> (x, attn) interface the PyTorch Encoder orchestrates.
# ---------------------------------------------------------------------------
class PallasSelfAttentionLayer:
    # TODO(synk): the real attn_layers / conv_layers of `Encoder` are injected
    # nn.Modules defined elsewhere; this is a Pallas-fused stand-in.

    def __init__(self, key, d_model, compute_dtype=jnp.bfloat16,
                 output_attention=False):
        kq, kk, kv, ko = jax.random.split(key, 4)
        s = 1.0 / math.sqrt(d_model)
        # Weights kept in bf16: halves resident VMEM/HBM (v7x-friendly) and
        # feeds the MXU at bf16 peak; accumulation stays in f32.
        self.wq = (jax.random.normal(kq, (d_model, d_model), jnp.float32) * s).astype(compute_dtype)
        self.wk = (jax.random.normal(kk, (d_model, d_model), jnp.float32) * s).astype(compute_dtype)
        self.wv = (jax.random.normal(kv, (d_model, d_model), jnp.float32) * s).astype(compute_dtype)
        self.wo = (jax.random.normal(ko, (d_model, d_model), jnp.float32) * s).astype(compute_dtype)
        self.scale = 1.0 / math.sqrt(d_model)
        self.compute_dtype = compute_dtype
        self.output_attention = output_attention

    @staticmethod
    def _mask_bias(attn_mask, l):
        if attn_mask is None:
            return None                        # no zero-bias DMA in this path
        m = jnp.asarray(attn_mask).reshape((-1, l, l))   # (1,L,L) or (B,L,L)
        return jnp.where(m, jnp.float32(-1e9), jnp.float32(0.0))

    def __call__(self, x, attn_mask=None, tau=None, delta=None, fused_norm=None):
        # TODO(synk): tau/delta de-stationary factors are consumed inside the
        # injected attention module of the original model; ignored here.
        b, l, d = x.shape
        bias = self._mask_bias(attn_mask, l)
        q, k, v = _qkv_projection(x, self.wq, self.wk, self.wv,
                                  compute_dtype=self.compute_dtype)
        norm_params = None
        ln_eps = 1e-5
        if fused_norm is not None:
            norm_params = (fused_norm.gamma, fused_norm.beta)
            ln_eps = fused_norm.eps
        y = _flash_attention(q, k, v, x, self.wo, bias, norm_params,
                             scale=self.scale,
                             compute_dtype=self.compute_dtype,
                             ln_eps=ln_eps)
        attn = None
        if self.output_attention:
            attn = _attention_probs(q, k, bias, scale=self.scale)
        return y, attn


# ---------------------------------------------------------------------------
# Encoder: exact mirror of the PyTorch forward control flow (+ fusion of the
# final LayerNorm into the last attention layer's epilogue when possible).
# ---------------------------------------------------------------------------
class Encoder:
    def __init__(self, attn_layers, conv_layers=None, norm_layer=None):
        self.attn_layers = list(attn_layers)
        self.conv_layers = list(conv_layers) if conv_layers is not None else None
        self.norm = norm_layer

    def __call__(self, x, attn_mask=None, tau=None, delta=None):
        attns = []
        if self.conv_layers is not None:
            for i, (attn_layer, conv_layer) in enumerate(
                    zip(self.attn_layers, self.conv_layers)):
                layer_delta = delta if i == 0 else None
                x, attn = attn_layer(x, attn_mask=attn_mask, tau=tau,
                                     delta=layer_delta)
                x = conv_layer(x)
                attns.append(attn)
            x, attn = self.attn_layers[-1](x, tau=tau, delta=None)
            attns.append(attn)
            if self.norm is not None:
                x = self.norm(x)
        else:
            n = len(self.attn_layers)
            fuse_final_norm = (
                self.norm is not None and isinstance(self.norm, PallasLayerNorm)
                and n > 0
                and isinstance(self.attn_layers[-1], PallasSelfAttentionLayer))
            for i, attn_layer in enumerate(self.attn_layers):
                if fuse_final_norm and i == n - 1:
                    x, attn = attn_layer(x, attn_mask=attn_mask, tau=tau,
                                         delta=delta, fused_norm=self.norm)
                else:
                    x, attn = attn_layer(x, attn_mask=attn_mask, tau=tau,
                                         delta=delta)
                attns.append(attn)
            if self.norm is not None and not fuse_final_norm:
                x = self.norm(x)
        return x, attns


# ---------------------------------------------------------------------------
# Pure-JAX references (mirroring the bf16 matmul operands of the kernels)
# ---------------------------------------------------------------------------
def _ref_attn_layer(layer, x, attn_mask=None):
    cd = layer.compute_dtype
    l = x.shape[1]
    xb = x.astype(cd)
    q = jnp.einsum("bld,de->ble", xb, layer.wq,
                   preferred_element_type=jnp.float32).astype(cd)
    k = jnp.einsum("bld,de->ble", xb, layer.wk,
                   preferred_element_type=jnp.float32).astype(cd)
    v = jnp.einsum("bld,de->ble", xb, layer.wv,
                   preferred_element_type=jnp.float32).astype(cd)
    s = jnp.einsum("bld,bmd->blm", q, k,
                   preferred_element_type=jnp.float32) * layer.scale
    if attn_mask is not None:
        m = jnp.asarray(attn_mask).reshape((-1, l, l))
        s = s + jnp.where(m, -1e9, 0.0)
    p = jax.nn.softmax(s, axis=-1)
    o = jnp.einsum("blm,bmd->bld", p.astype(cd), v,
                   preferred_element_type=jnp.float32)
    y = x + jnp.einsum("bld,de->ble", o.astype(cd), layer.wo,
                       preferred_element_type=jnp.float32)
    return y, p


def _ref_layer_norm(norm, x):
    mu = x.mean(-1, keepdims=True)
    var = ((x - mu) ** 2).mean(-1, keepdims=True)
    return (x - mu) / jnp.sqrt(var + norm.eps) * norm.gamma + norm.beta


if __name__ == "__main__":
    B, L, D = 2, 8, 32
    key = jax.random.PRNGKey(0)
    kx, k1, k2 = jax.random.split(key, 3)
    x = jax.random.normal(kx, (B, L, D), jnp.float32)

    attn_layers = [PallasSelfAttentionLayer(k1, D, output_attention=True),
                   PallasSelfAttentionLayer(k2, D, output_attention=True)]
    norm = PallasLayerNorm(D)
    enc = Encoder(attn_layers, conv_layers=None, norm_layer=norm)

    # ---- no-mask path (no-bias kernel variant + fused final LayerNorm) ----
    y, attns = enc(x, attn_mask=None)
    y = jax.block_until_ready(y)

    xr = x
    ref_attns = []
    for layer in attn_layers:
        xr, a = _ref_attn_layer(layer, xr, None)
        ref_attns.append(a)
    yr = _ref_layer_norm(norm, xr)

    assert y.shape == (B, L, D), y.shape
    assert len(attns) == len(attn_layers)
    err = float(jnp.max(jnp.abs(y - yr)))
    assert err < 2e-2, f"no-mask path error {err}"
    for a, ar in zip(attns, ref_attns):
        assert a.shape == (B, L, L)
        aerr = float(jnp.max(jnp.abs(a.astype(jnp.float32) - ar)))
        assert aerr < 2e-2, f"attention prob error {aerr}"

    # ---- causal-mask path (exercises the bias kernel variant) ----
    causal = jnp.triu(jnp.ones((L, L), jnp.float32), k=1) > 0   # True == masked
    ym, _ = enc(x, attn_mask=causal)
    ym = jax.block_until_ready(ym)

    xr = x
    for layer in attn_layers:
        xr, _ = _ref_attn_layer(layer, xr, causal)
    yrm = _ref_layer_norm(norm, xr)
    errm = float(jnp.max(jnp.abs(ym - yrm)))
    assert errm < 2e-2, f"masked path error {errm}"

    # ---- standalone LayerNorm kernel (used on the conv-layer path) ----
    ln = jax.block_until_ready(
        pallas_layer_norm(x, norm.gamma, norm.beta, eps=norm.eps))
    lerr = float(jnp.max(jnp.abs(ln - _ref_layer_norm(norm, x))))
    assert lerr < 1e-4, f"layernorm error {lerr}"

    print("KERNEL_OK")
</pallas_src>

<mosaic_0001>
module attributes {stable_mosaic.version = 11 : i64} {
  func.func @_qkv_proj_kernel(%arg0: i32, %arg1: memref<16x32xf32, #tpu.memory_space<vmem>>, %arg2: memref<32x32xbf16, #tpu.memory_space<vmem>>, %arg3: memref<32x32xbf16, #tpu.memory_space<vmem>>, %arg4: memref<32x32xbf16, #tpu.memory_space<vmem>>, %arg5: memref<16x32xbf16, #tpu.memory_space<vmem>>, %arg6: memref<16x32xbf16, #tpu.memory_space<vmem>>, %arg7: memref<16x32xbf16, #tpu.memory_space<vmem>>) attributes {dimension_semantics = [#tpu.dimension_semantics<parallel>], iteration_bounds = array<i64: 1>, scalar_prefetch = 0 : i64, scratch_operands = 0 : i64, tpu.core_type = #tpu.core_type<tc>, window_params = [{transform_indices = @transform_0, window_bounds = array<i64: 16, 32>}, {pipeline_mode = #tpu.pipeline_mode<synchronous>, transform_indices = @transform_1, window_bounds = array<i64: 32, 32>}, {pipeline_mode = #tpu.pipeline_mode<synchronous>, transform_indices = @transform_2, window_bounds = array<i64: 32, 32>}, {pipeline_mode = #tpu.pipeline_mode<synchronous>, transform_indices = @transform_3, window_bounds = array<i64: 32, 32>}, {transform_indices = @transform_4, window_bounds = array<i64: 16, 32>}, {transform_indices = @transform_5, window_bounds = array<i64: 16, 32>}, {transform_indices = @transform_6, window_bounds = array<i64: 16, 32>}]} {
    %c0 = arith.constant 0 : index
    %c0_0 = arith.constant 0 : index
    %0 = vector.load %arg1[%c0, %c0_0] : memref<16x32xf32, #tpu.memory_space<vmem>>, vector<16x32xf32>
    %1 = arith.truncf %0 : vector<16x32xf32> to vector<16x32xbf16>
    %c0_1 = arith.constant 0 : index
    %c0_2 = arith.constant 0 : index
    %2 = vector.load %arg2[%c0_1, %c0_2] : memref<32x32xbf16, #tpu.memory_space<vmem>>, vector<32x32xbf16>
    %cst = arith.constant dense<0.000000e+00> : vector<16x32xf32>
    %3 = tpu.matmul %1, %2, %cst {dimension_numbers = #tpu.dot_dimension_numbers<[1], [0], [0], [1], [0, 0, 1, 1], [], []>} : vector<16x32xbf16>, vector<32x32xbf16>, vector<16x32xf32> -> vector<16x32xf32>
    %4 = arith.truncf %3 : vector<16x32xf32> to vector<16x32xbf16>
    %c0_3 = arith.constant 0 : index
    %c0_4 = arith.constant 0 : index
    %5 = vector.load %arg5[%c0_3, %c0_4] : memref<16x32xbf16, #tpu.memory_space<vmem>>, vector<16x32xbf16>
    tpu.vector_store %arg5[%c0_3, %c0_4], %4 {strides = array<i32>} : memref<16x32xbf16, #tpu.memory_space<vmem>>, vector<16x32xbf16>,
    %c0_5 = arith.constant 0 : index
    %c0_6 = arith.constant 0 : index
    %6 = vector.load %arg3[%c0_5, %c0_6] : memref<32x32xbf16, #tpu.memory_space<vmem>>, vector<32x32xbf16>
    %cst_7 = arith.constant dense<0.000000e+00> : vector<16x32xf32>
    %7 = tpu.matmul %1, %6, %cst_7 {dimension_numbers = #tpu.dot_dimension_numbers<[1], [0], [0], [1], [0, 0, 1, 1], [], []>} : vector<16x32xbf16>, vector<32x32xbf16>, vector<16x32xf32> -> vector<16x32xf32>
    %8 = arith.truncf %7 : vector<16x32xf32> to vector<16x32xbf16>
    %c0_8 = arith.constant 0 : index
    %c0_9 = arith.constant 0 : index
    %9 = vector.load %arg6[%c0_8, %c0_9] : memref<16x32xbf16, #tpu.memory_space<vmem>>, vector<16x32xbf16>
    tpu.vector_store %arg6[%c0_8, %c0_9], %8 {strides = array<i32>} : memref<16x32xbf16, #tpu.memory_space<vmem>>, vector<16x32xbf16>,
    %c0_10 = arith.constant 0 : index
    %c0_11 = arith.constant 0 : index
    %10 = vector.load %arg4[%c0_10, %c0_11] : memref<32x32xbf16, #tpu.memory_space<vmem>>, vector<32x32xbf16>
    %cst_12 = arith.constant dense<0.000000e+00> : vector<16x32xf32>
    %11 = tpu.matmul %1, %10, %cst_12 {dimension_numbers = #tpu.dot_dimension_numbers<[1], [0], [0], [1], [0, 0, 1, 1], [], []>} : vector<16x32xbf16>, vector<32x32xbf16>, vector<16x32xf32> -> vector<16x32xf32>
    %12 = arith.truncf %11 : vector<16x32xf32> to vector<16x32xbf16>
    %c0_13 = arith.constant 0 : index
    %c0_14 = arith.constant 0 : index
    %13 = vector.load %arg7[%c0_13, %c0_14] : memref<16x32xbf16, #tpu.memory_space<vmem>>, vector<16x32xbf16>
    tpu.vector_store %arg7[%c0_13, %c0_14], %12 {strides = array<i32>} : memref<16x32xbf16, #tpu.memory_space<vmem>>, vector<16x32xbf16>,
    return
  }
  func.func @transform_0(%arg0: i32) -> (i32, i32) {
    %c0_i32 = arith.constant 0 : i32
    %c0_i32_0 = arith.constant 0 : i32
    return %arg0, %c0_i32 : i32, i32
  }
  func.func @transform_1(%arg0: i32) -> (i32, i32) {
    %c0_i32 = arith.constant 0 : i32
    %c0_i32_0 = arith.constant 0 : i32
    %c0_i32_1 = arith.constant 0 : i32
    return %c0_i32, %c0_i32_0 : i32, i32
  }
  func.func @transform_2(%arg0: i32) -> (i32, i32) {
    %c0_i32 = arith.constant 0 : i32
    %c0_i32_0 = arith.constant 0 : i32
    %c0_i32_1 = arith.constant 0 : i32
    return %c0_i32, %c0_i32_0 : i32, i32
  }
  func.func @transform_3(%arg0: i32) -> (i32, i32) {
    %c0_i32 = arith.constant 0 : i32
    %c0_i32_0 = arith.constant 0 : i32
    %c0_i32_1 = arith.constant 0 : i32
    return %c0_i32, %c0_i32_0 : i32, i32
  }
  func.func @transform_4(%arg0: i32) -> (i32, i32) {
    %c0_i32 = arith.constant 0 : i32
    %c0_i32_0 = arith.constant 0 : i32
    return %arg0, %c0_i32 : i32, i32
  }
  func.func @transform_5(%arg0: i32) -> (i32, i32) {
    %c0_i32 = arith.constant 0 : i32
    %c0_i32_0 = arith.constant 0 : i32
    return %arg0, %c0_i32 : i32, i32
  }
  func.func @transform_6(%arg0: i32) -> (i32, i32) {
    %c0_i32 = arith.constant 0 : i32
    %c0_i32_0 = arith.constant 0 : i32
    return %arg0, %c0_i32 : i32, i32
  }
}

</mosaic_0001>

<bundles_post_ra>
// kernel: tpu_custom_call.1
= control target key start
LH: loop header
LB: loop body
LE: loop exit
PB: predicated region body
PF: predicated region fallthrough
CT: control target
= control target key end

     0   :  { %12 = vsyncpa [#allocation3], 0  ;;  %s747_s0 = inlined_call_operand.hbm [shape: f32[16,32], index: 0, kind: input, shape index: {}]   ;;  %s748_s1 = inlined_call_operand.hbm [shape: bf16[32,32], index: 1, kind: input, shape index: {}]   ;;  %s749_s2 = inlined_call_operand.hbm [shape: bf16[32,32], index: 2, kind: input, shape index: {}]   ;;  %s750_s3 = inlined_call_operand.hbm [shape: bf16[32,32], index: 3, kind: input, shape index: {}]   ;;  %s751_s4 = inlined_call_operand.hbm [shape: bf16[16,32], index: 4, kind: output, shape index: {0}]   ;;  %s752_s5 = inlined_call_operand.hbm [shape: bf16[16,32], index: 5, kind: output, shape index: {1}]   ;;  %s753_s6 = inlined_call_operand.hbm [shape: bf16[16,32], index: 6, kind: output, shape index: {2}]  }
   0x1   :  { %13 = vsyncpa [#allocation6], 0 }
   0x2   :  { %14 = vsyncpa [#allocation9], 0 }
   0x3   :  { %15 = vsyncpa [#allocation4], 0 }
   0x4   :  { %16 = vsyncpa [#allocation12], 0  ;;  %s574_s21 = smov [#allocation5]   ;;  %s410_s25 = scalar_lea.hbm %s748_s1, 256 }
   0x5   :  { %s34_s22 = sshll.u32 %s574_s21, 4  ;;  %p411_p0 = scmp.ne.s32.totalorder %s748_s1, %s410_s25  ;;  %s35_s22 = int_to_ptr.vmem [resolvable:$true] %s34_s22 }
   0x6   :  { %p414_p1 = scmp.lt.u32.totalorder %s410_s25, %s748_s1 }
   0x8   :  { %p416_p2 = pnand %p414_p1, %p411_p0 }
   0xa   :  { %419 = shalt.err (!%p416_p2)
}
   0xb   :  { %s420_s30 = scalar_lea.vmem %s35_s22, 256  ;;  %p425_p4 = scmp.lt.s32.totalorder %s35_s22, %s35_s22 }
   0xc   :  { %p421_p3 = scmp.ne.s32.totalorder %s35_s22, %s420_s30  ;;  %p426_p5 = scmp.lt.s32.totalorder %s420_s30, %s420_s30 }
   0xe   :  { %p427_p6 = por %p426_p5, %p425_p4 }
  0x10   :  { %p428_p7 = pnand %p427_p6, %p421_p3 }
  0x12   :  { %431 = shalt.err (!%p428_p7)
}
  0x13   :  { %s575_s7 = smov 64   ;;  %s576_s8 = smov 4  }
  0x14   :  { %40 = dma.hbm_to_vmem [thread:$0]  %s748_s1, 256, %s35_s22, [#allocation6], %s575_s7, %s575_s7, %s576_s8  }
  0x15   :  { %s577_s11 = smov [#allocation2]   ;;  %s432_s15 = scalar_lea.hbm %s747_s0, 256 }
  0x16   :  { %s22_s12 = sshll.u32 %s577_s11, 4  ;;  %p433_p8 = scmp.ne.s32.totalorder %s747_s0, %s432_s15  ;;  %s23_s12 = int_to_ptr.vmem [resolvable:$true] %s22_s12 }
  0x17   :  { %p436_p9 = scmp.lt.u32.totalorder %s432_s15, %s747_s0 }
  0x19   :  { %p438_p10 = pnand %p436_p9, %p433_p8 }
  0x1b   :  { %441 = shalt.err (!%p438_p10)
}
  0x1c   :  { %s442_s20 = scalar_lea.vmem %s23_s12, 256  ;;  %p447_p12 = scmp.lt.s32.totalorder %s23_s12, %s23_s12 }
  0x1d   :  { %p443_p11 = scmp.ne.s32.totalorder %s23_s12, %s442_s20  ;;  %p448_p13 = scmp.lt.s32.totalorder %s442_s20, %s442_s20 }
  0x1f   :  { %p449_p0 = por %p448_p13, %p447_p12 }
  0x21   :  { %p450_p1 = pnand %p449_p0, %p443_p11 }
  0x23   :  { %453 = shalt.err (!%p450_p1)
}
  0x24   :  { %s578_s1 = smov 128   ;;  %s579_s21 = smov 8  }
  0x25   :  { %28 = dma.hbm_to_vmem [thread:$0]  %s747_s0, 256, %s23_s12, [#allocation3], %s578_s1, %s578_s1, %s579_s21  }
  0x26   :  { %s580_s24 = smov [#allocation7]   ;;  %s581_s26 = smov [#allocation8]  }
  0x27   :  { %s46_s25 = sshll.u32 %s580_s24, 4  ;;  %s58_s27 = sshll.u32 %s581_s26, 4  ;;  %s47_s25 = int_to_ptr.vmem [resolvable:$true] %s46_s25  ;;  %s649_s27 = int_to_ptr.vmem [resolvable:$true] %s58_s27 }
  0x28   :  { %s454_s30 = scalar_lea.hbm %s749_s2, 256 }
  0x29   :  { %p455_p2 = scmp.ne.s32.totalorder %s749_s2, %s454_s30  ;;  %p458_p3 = scmp.lt.u32.totalorder %s454_s30, %s749_s2 }
  0x2b   :  { %p460_p4 = pnand %p458_p3, %p455_p2 }
  0x2d   :  { %463 = shalt.err (!%p460_p4)
}
  0x2e   :  { %s464_s0 = scalar_lea.vmem %s47_s25, 256  ;;  %p469_p6 = scmp.lt.s32.totalorder %s47_s25, %s47_s25 }
  0x2f   :  { %p465_p5 = scmp.ne.s32.totalorder %s47_s25, %s464_s0  ;;  %p470_p7 = scmp.lt.s32.totalorder %s464_s0, %s464_s0 }
  0x31   :  { %p471_p8 = por %p470_p7, %p469_p6 }
  0x33   :  { %p472_p9 = pnand %p471_p8, %p465_p5 }
  0x35   :  { %475 = shalt.err (!%p472_p9)
}
  0x36   :  { %52 = dma.hbm_to_vmem [thread:$0]  %s749_s2, 256, %s47_s25, [#allocation6], %s575_s7, %s575_s7, %s576_s8  }
  0x37   :  { %s476_s17 = scalar_lea.hbm %s750_s3, 256 }
  0x38   :  { %p477_p10 = scmp.ne.s32.totalorder %s750_s3, %s476_s17  ;;  %p480_p11 = scmp.lt.u32.totalorder %s476_s17, %s750_s3 }
  0x3a   :  { %p482_p12 = pnand %p480_p11, %p477_p10 }
  0x3c   :  { %485 = shalt.err (!%p482_p12)
}
  0x3d   :  { %s486_s21 = scalar_lea.vmem %s649_s27, 256  ;;  %p491_p0 = scmp.lt.s32.totalorder %s649_s27, %s649_s27 }
  0x3e   :  { %p487_p13 = scmp.ne.s32.totalorder %s649_s27, %s486_s21  ;;  %p492_p1 = scmp.lt.s32.totalorder %s486_s21, %s486_s21 }
  0x40   :  { %p493_p2 = por %p492_p1, %p491_p0 }
  0x42   :  { %p494_p3 = pnand %p493_p2, %p487_p13 }
  0x44   :  { %497 = shalt.err (!%p494_p3)
}
  0x45   :  { %64 = dma.hbm_to_vmem [thread:$0]  %s750_s3, 256, %s649_s27, [#allocation9], %s575_s7, %s575_s7, %s576_s8  }
  0x46   :  { %564 = dma.done.wait [#allocation3], 256  }
  0x47   :  { %565 = vsyncadd [#allocation3], 4294967040 }
  0x48   :  { %566 = dma.done.wait [#allocation6], 512  }
  0x49   :  { %567 = vsyncadd [#allocation6], 4294966784 }
  0x4a   :  { %568 = dma.done.wait [#allocation9], 256  }
  0x4b   :  { %569 = vsyncadd [#allocation9], 4294967040  ;;  %v582_v0 = vmov 0.0   ;;  %vm583_vm0 = vmmov 0   ;;  %v404_v1 = vld [vmem:[#allocation5] sm:$0xff]   ;;  %v405_v2 = vld [vmem:[#allocation5 + $0x8] sm:$0xff]  }
  0x4c   :  { %367 = vmatprep.subr.bf16.mxu0 %v582_v0  ;;  %375 = vmatprep.subr.bf16.mxu1 %v582_v0  ;;  %v406_v3 = vld [vmem:[#allocation7] sm:$0xff]   ;;  %v79_v5 = vld [vmem:[#allocation2 + $0x8] sm:$0xff]  ;;  %vm97_vm1 = vcmask 261120   ;;  %v407_v8 = vld [vmem:[#allocation8] sm:$0xff]   ;;  %vm150_vm2 = vcmask 257024   ;;  %s584_s3 = smov [#allocation10]  }
  0x4d   :  { %371 = vmatprep.mubr.msk.bf16.mxu0 %vm583_vm0, %v582_v0  ;;  %379 = vmatprep.mubr.msk.bf16.mxu1 %vm583_vm0, %v582_v0  ;;  %v78_v4 = vld [vmem:[#allocation2] sm:$0xff]  ;;  %v408_v7 = vld [vmem:[#allocation7 + $0x8] sm:$0xff]   ;;  %v409_v9 = vld [vmem:[#allocation8 + $0x8] sm:$0xff]   ;;  %s292_s23 = sshll.u32 %s584_s3, 4  ;;  %s585_s24 = smov [#allocation11]   ;;  %s293_s23 = int_to_ptr.vmem [resolvable:$true] %s292_s23 }
  0x4e   :  { %368 = vmatpush3.bf16.msra.mxu0 %v404_v1  ;;  %376 = vmatpush3.bf16.msra.mxu1 %v406_v3  ;;  %v80_v6 = vpack.c.bf16 %v79_v5, %v78_v4  ;;  %s304_s25 = sshll.u32 %s585_s24, 4  ;;  %s498_s26 = scalar_lea.vmem %s293_s23, 128  ;;  %s692_s25 = int_to_ptr.vmem [resolvable:$true] %s304_s25 }
  0x4f   :  { %369 = vmatprep.subr.bf16.mxu0 %v582_v0  ;;  %377 = vmatprep.subr.bf16.mxu1 %v582_v0  ;;  %p499_p4 = scmp.ne.s32.totalorder %s293_s23, %s498_s26  ;;  %p503_p5 = scmp.lt.s32.totalorder %s293_s23, %s293_s23 }
  0x50   :  { %p504_p6 = scmp.lt.s32.totalorder %s498_s26, %s498_s26 }
  0x52   :  { %370 = vmatpush3.bf16.msra.mxu0 %v405_v2  ;;  %378 = vmatpush3.bf16.msra.mxu1 %v408_v7  ;;  %p505_p7 = por %p504_p6, %p503_p5 }
  0x53   :  { %383 = vmatprep.subr.bf16.mxu0 %v582_v0 }
  0x54   :  { %p506_p8 = pnand %p505_p7, %p499_p4 }
  0x55   :  { %372 = vmatmul.mubr.msk.bf16.vlgmr.msra.gmra.mrb[0].mxu0 %vm97_vm1, %v80_v6  ;;  %380 = vmatmul.mubr.msk.bf16.vlgmr.msra.gmra.mrb[0].mxu1 %vm97_vm1, %v80_v6 }
  0x56   :  { %384 = vmatpush3.bf16.msra.mxu0 %v407_v8  ;;  %387 = vmatprep.mubr.msk.bf16.mxu0 %vm583_vm0, %v582_v0 }
  0x57   :  { %385 = vmatprep.subr.bf16.mxu0 %v582_v0 }
  0x5a   :  { %386 = vmatpush3.bf16.msra.mxu0 %v409_v9 }
  0x5d   :  { %388 = vmatmul.mubr.msk.bf16.vlgmr.msra.gmra.mrb[4].mxu0 %vm97_vm1, %v80_v6 }
 0x128   :  { %v135_v10 = vpop.f32.mrb[0].mxu0  ;;  %v203_v14 = vpop.f32.mrb[0].mxu1 }
 0x129   :  { %v352_v11 = vpack.c.bf16 %v135_v10, %v135_v10  ;;  %v373_v12 = vpop.f32.mrb[1].mxu0  ;;  %v354_v17 = vpack.c.bf16 %v203_v14, %v203_v14  ;;  %v381_v18 = vpop.f32.mrb[1].mxu1 }
 0x12a   :  { %v138_v13 = vpop.f32.mrb[2].mxu0  ;;  %v206_v19 = vpop.f32.mrb[2].mxu1 }
 0x12b   :  { %v353_v15 = vpack.c.bf16 %v138_v13, %v138_v13  ;;  %v374_v16 = vpop.f32.mrb[3].mxu0  ;;  %151 = vst.msk [vmem:[#allocation10] sm:$0xf] %vm150_vm2, %v352_v11  ;;  %v355_v20 = vpack.c.bf16 %v206_v19, %v206_v19  ;;  %v382_v21 = vpop.f32.mrb[3].mxu1  ;;  %218 = vst.msk [vmem:[#allocation11] sm:$0xf] %vm150_vm2, %v354_v17 }
 0x12d   :  { %152 = vst.msk [vmem:[#allocation10 + $0x4] sm:$0xf] %vm150_vm2, %v353_v15 }
 0x12e   :  { %509 = shalt.err (!%p506_p8)
}
 0x12f   :  { %s510_s29 = scalar_lea.hbm %s751_s4, 128 }
 0x130   :  { %p511_p9 = scmp.ne.s32.totalorder %s751_s4, %s510_s29  ;;  %p514_p10 = scmp.lt.u32.totalorder %s510_s29, %s751_s4 }
 0x132   :  { %p516_p11 = pnand %p514_p10, %p511_p9 }
 0x134   :  { %519 = shalt.err (!%p516_p11)
}
 0x135   :  { %298 = dma.vmem_to_hbm [thread:$0]  %s293_s23, 128, %s751_s4, [#allocation4], %s575_s7, %s575_s7, %s576_s8   ;;  %219 = vst.msk [vmem:[#allocation11 + $0x4] sm:$0xf] %vm150_vm2, %v355_v20  ;;  %v270_v22 = vpop.f32.mrb[4].mxu0 }
 0x136   :  { %s586_s12 = smov [#allocation13]   ;;  %s520_s15 = scalar_lea.vmem %s692_s25, 128 }
 0x137   :  { %s316_s14 = sshll.u32 %s586_s12, 4  ;;  %p521_p12 = scmp.ne.s32.totalorder %s692_s25, %s520_s15  ;;  %s317_s14 = int_to_ptr.vmem [resolvable:$true] %s316_s14 }
 0x138   :  { %p525_p13 = scmp.lt.s32.totalorder %s692_s25, %s692_s25  ;;  %p526_p0 = scmp.lt.s32.totalorder %s520_s15, %s520_s15 }
 0x13a   :  { %p527_p1 = por %p526_p0, %p525_p13 }
 0x13c   :  { %p528_p2 = pnand %p527_p1, %p521_p12 }
 0x13e   :  { %531 = shalt.err (!%p528_p2)
}
 0x13f   :  { %s532_s18 = scalar_lea.hbm %s752_s5, 128 }
 0x140   :  { %p533_p3 = scmp.ne.s32.totalorder %s752_s5, %s532_s18  ;;  %p536_p4 = scmp.lt.u32.totalorder %s532_s18, %s752_s5 }
 0x142   :  { %p538_p5 = pnand %p536_p4, %p533_p3 }
 0x144   :  { %541 = shalt.err (!%p538_p5)
}
 0x145   :  { %310 = dma.vmem_to_hbm [thread:$0]  %s692_s25, 128, %s752_s5, [#allocation12], %s575_s7, %s575_s7, %s576_s8   ;;  %v356_v23 = vpack.c.bf16 %v270_v22, %v270_v22  ;;  %v389_v24 = vpop.f32.mrb[5].mxu0 }
 0x146   :  { %v273_v25 = vpop.f32.mrb[6].mxu0  ;;  %s542_s22 = scalar_lea.vmem %s317_s14, 128  ;;  %p547_p7 = scmp.lt.s32.totalorder %s317_s14, %s317_s14 }
 0x147   :  { %285 = vst.msk [vmem:[#allocation13] sm:$0xf] %vm150_vm2, %v356_v23  ;;  %v357_v26 = vpack.c.bf16 %v273_v25, %v273_v25  ;;  %v390_v27 = vpop.f32.mrb[7].mxu0  ;;  %p543_p6 = scmp.ne.s32.totalorder %s317_s14, %s542_s22  ;;  %p548_p8 = scmp.lt.s32.totalorder %s542_s22, %s542_s22 }
 0x149   :  { %286 = vst.msk [vmem:[#allocation13 + $0x4] sm:$0xf] %vm150_vm2, %v357_v26  ;;  %p549_p9 = por %p548_p8, %p547_p7 }
 0x14b   :  { %p550_p10 = pnand %p549_p9, %p543_p6 }
 0x14d   :  { %553 = shalt.err (!%p550_p10)
}
 0x14e   :  { %s554_s5 = scalar_lea.hbm %s753_s6, 128 }
 0x14f   :  { %p555_p11 = scmp.ne.s32.totalorder %s753_s6, %s554_s5  ;;  %p558_p12 = scmp.lt.u32.totalorder %s554_s5, %s753_s6 }
 0x151   :  { %p560_p13 = pnand %p558_p12, %p555_p11 }
 0x153   :  { %563 = shalt.err (!%p560_p13)
}
 0x154   :  { %322 = dma.vmem_to_hbm [thread:$0]  %s317_s14, 128, %s753_s6, [#allocation12], %s575_s7, %s575_s7, %s576_s8  }
 0x155   :  { %570 = dma.done.wait [#allocation4], 128  }
 0x156   :  { %571 = vsyncadd [#allocation4], 4294967168 }
 0x157   :  { %572 = dma.done.wait [#allocation12], 256  }
 0x158   :  { %573 = vsyncadd [#allocation12], 4294967040 }
 0x159   :  { %332 = vsyncpa [#allocation3], 1 }
 0x15a   :  { %333 = vsyncpa [#allocation6], 1 }
 0x15b   :  { %334 = vsyncpa [#allocation9], 1 }
 0x15c   :  { %335 = vsyncpa [#allocation4], 1 }
 0x15d   :  { %336 = vsyncpa [#allocation12], 1 }

</bundles_post_ra>
